<compile_context>
chip_gen: v7x
topology: tpu7x:2x2x1
jax: 0.10.0
libtpu: 0.0.40
codegen_flags: <defaults>
</compile_context>

<pallas_src>
import functools

import jax
import jax.numpy as jnp
from jax.experimental import pallas as pl
from jax.experimental.pallas import tpu as pltpu


_VMEM_LIMIT_BYTES = 48 * 1024 * 1024   # below physical VMEM on v5e/v6e/v7x
_TILE_VMEM_BUDGET = 32 * 1024 * 1024   # budget for the pipelined tile buffers
_MAX_TT = 4096                         # cap on the time tile (lanes)


def _round_up(n, m):
    return ((n + m - 1) // m) * m


def _choose_time_tile(c_pad, t, itemsize):
    """Largest multiple-of-128 time tile whose pipeline buffers fit the budget."""
    # Apply phase holds ~4 live (C_pad, TT) buffers (double-buffered in + out).
    per_col = 4 * c_pad * max(int(itemsize), 4)
    tt = (_TILE_VMEM_BUDGET // per_col) // 128 * 128
    tt = max(128, min(_MAX_TT, tt))
    t128 = _round_up(t, 128)
    return t128 if t128 <= tt else tt


def _grn_reduce_kernel(x_ref, gamma_ref, scale_ref, ssq_ref, *, eps, c_real):
    """Phase 1: accumulate sum(x^2) over T; finalize scale = gamma*nx + 1."""
    t = pl.program_id(1)

    @pl.when(t == 0)
    def _():
        ssq_ref[...] = jnp.zeros_like(ssq_ref)

    x = x_ref[...].astype(jnp.float32)                       # (1, C_pad, TT)
    ssq_ref[...] += jnp.sum(x * x, axis=2, keepdims=True)    # (1, C_pad, 1)

    @pl.when(t == pl.num_programs(1) - 1)
    def _():
        gx = jnp.sqrt(ssq_ref[...])                          # (1, C_pad, 1)
        # Zero-padded channels contribute 0 to the sum; divide by the real C.
        gx_mean = jnp.sum(gx, axis=1, keepdims=True) * (1.0 / c_real)
        inv = pl.reciprocal(gx_mean + eps, approx=True)      # EUP slot
        nx = gx * inv
        gamma = gamma_ref[...].astype(jnp.float32)
        scale_ref[...] = gamma * nx + 1.0                    # (1, C_pad, 1)


def _grn_apply_kernel(x_ref, scale_ref, beta_ref, o_ref):
    """Phase 2: out = x * scale + beta (single FMA per element)."""
    x = x_ref[...].astype(jnp.float32)
    scale = scale_ref[...]                                   # already f32
    beta = beta_ref[...].astype(jnp.float32)
    o_ref[...] = (x * scale + beta).astype(o_ref.dtype)


def grn(x, gamma, beta, eps=1e-6):
    """x: (B, C, T); gamma, beta: (1, C, 1). Returns (B, C, T) in x.dtype."""
    B, C, T = x.shape
    itemsize = jnp.dtype(x.dtype).itemsize

    C_pad = _round_up(C, 8)
    TT = _choose_time_tile(C_pad, T, itemsize)
    T_pad = _round_up(T, TT)
    nT = T_pad // TT

    # Zero padding: does not perturb sum(x^2); padded channels get gamma=beta=0
    # so their (unused) outputs are just x_pad = 0; sliced off below.
    if (C_pad, T_pad) != (C, T):
        x_p = jnp.pad(x, ((0, 0), (0, C_pad - C), (0, T_pad - T)))
    else:
        x_p = x
    if C_pad != C:
        gamma_p = jnp.pad(gamma, ((0, 0), (0, C_pad - C), (0, 0)))
        beta_p = jnp.pad(beta, ((0, 0), (0, C_pad - C), (0, 0)))
    else:
        gamma_p, beta_p = gamma, beta

    # ------------- Phase 1: scale = gamma * nx + 1, shape (B, C_pad, 1) -----
    reduce_kernel = functools.partial(_grn_reduce_kernel, eps=eps, c_real=float(C))
    scale = pl.pallas_call(
        reduce_kernel,
        out_shape=jax.ShapeDtypeStruct((B, C_pad, 1), jnp.float32),
        grid_spec=pltpu.PrefetchScalarGridSpec(
            num_scalar_prefetch=0,
            grid=(B, nT),
            in_specs=[
                pl.BlockSpec((1, C_pad, TT), lambda b, t: (b, 0, t)),
                pl.BlockSpec((1, C_pad, 1), lambda b, t: (0, 0, 0)),
            ],
            out_specs=pl.BlockSpec((1, C_pad, 1), lambda b, t: (b, 0, 0)),
            scratch_shapes=[pltpu.VMEM((1, C_pad, 1), jnp.float32)],
        ),
        compiler_params=pltpu.CompilerParams(
            dimension_semantics=("parallel", "arbitrary"),
            vmem_limit_bytes=_VMEM_LIMIT_BYTES,
        ),
        cost_estimate=pl.CostEstimate(
            flops=2 * B * C_pad * T_pad + 8 * B * C_pad,
            transcendentals=B * C_pad + B,
            bytes_accessed=B * C_pad * T_pad * itemsize + 2 * B * C_pad * 4,
        ),
    )(x_p, gamma_p)

    # ------------- Phase 2: out = x * scale + beta ---------------------------
    out_p = pl.pallas_call(
        _grn_apply_kernel,
        out_shape=jax.ShapeDtypeStruct((B, C_pad, T_pad), x.dtype),
        grid_spec=pltpu.PrefetchScalarGridSpec(
            num_scalar_prefetch=0,
            grid=(B, nT),
            in_specs=[
                pl.BlockSpec((1, C_pad, TT), lambda b, t: (b, 0, t)),
                pl.BlockSpec((1, C_pad, 1), lambda b, t: (b, 0, 0)),
                pl.BlockSpec((1, C_pad, 1), lambda b, t: (0, 0, 0)),
            ],
            out_specs=pl.BlockSpec((1, C_pad, TT), lambda b, t: (b, 0, t)),
        ),
        compiler_params=pltpu.CompilerParams(
            dimension_semantics=("parallel", "parallel"),
            vmem_limit_bytes=_VMEM_LIMIT_BYTES,
        ),
        cost_estimate=pl.CostEstimate(
            flops=2 * B * C_pad * T_pad,
            transcendentals=0,
            bytes_accessed=2 * B * C_pad * T_pad * itemsize + B * C_pad * 4,
        ),
    )(x_p, scale, beta_p)

    if (C_pad, T_pad) != (C, T):
        out_p = out_p[:, :C, :T]
    return out_p


def grn_ref(x, gamma, beta, eps=1e-6):
    gx = jnp.sqrt(jnp.sum(x * x, axis=2, keepdims=True))
    nx = gx / (jnp.mean(gx, axis=1, keepdims=True) + eps)
    return gamma * (x * nx) + beta + x


if __name__ == "__main__":
    key = jax.random.PRNGKey(0)
    B, C, T = 2, 4, 16

    kx, kg, kb = jax.random.split(key, 3)
    x = jax.random.normal(kx, (B, C, T), dtype=jnp.float32)
    # Module initializes gamma/beta to zeros; use small deterministic values
    # instead so the gamma/beta path is actually exercised.
    gamma = 0.1 * jax.random.normal(kg, (1, C, 1), dtype=jnp.float32)
    beta = 0.1 * jax.random.normal(kb, (1, C, 1), dtype=jnp.float32)

    out = jax.block_until_ready(grn(x, gamma, beta))
    expected = grn_ref(x, gamma, beta)

    assert out.shape == (B, C, T)
    assert out.dtype == x.dtype
    # Tolerance allows for the EUP approximate reciprocal used on the channel
    # mean (perf-review suggestion); pass approx=False in _grn_reduce_kernel
    # for exact f32 division.
    max_diff = float(jnp.max(jnp.abs(out - expected)))
    assert jnp.allclose(out, expected, atol=5e-3, rtol=1e-3), (
        f"mismatch vs reference: max abs diff = {max_diff}")
    print("KERNEL_OK")
</pallas_src>

<mosaic_0001>
module attributes {stable_mosaic.version = 11 : i64} {
  func.func @_grn_reduce_kernel(%arg0: i32, %arg1: i32, %arg2: memref<1x8x128xf32, #tpu.memory_space<vmem>>, %arg3: memref<1x8x1xf32, #tpu.memory_space<vmem>>, %arg4: memref<1x8x1xf32, #tpu.memory_space<vmem>>, %arg5: memref<1x8x1xf32, #tpu.memory_space<vmem>>) attributes {dimension_semantics = [#tpu.dimension_semantics<parallel>, #tpu.dimension_semantics<arbitrary>], iteration_bounds = array<i64: 2, 1>, scalar_prefetch = 0 : i64, scratch_operands = 1 : i64, tpu.core_type = #tpu.core_type<tc>, window_params = [{transform_indices = @transform_0, window_bounds = array<i64: 1, 8, 128>}, {pipeline_mode = #tpu.pipeline_mode<synchronous>, transform_indices = @transform_1, window_bounds = array<i64: 1, 8, 1>}, {transform_indices = @transform_2, window_bounds = array<i64: 1, 8, 1>}]} {
    %c0_i32 = arith.constant 0 : i32
    %0 = arith.cmpi eq, %arg1, %c0_i32 : i32
    %1 = arith.extui %0 : i1 to i32
    %c0_i32_0 = arith.constant 0 : i32
    %2 = arith.cmpi ne, %1, %c0_i32_0 : i32
    scf.if %2 {
      %cst_11 = arith.constant 0.000000e+00 : f32
      %13 = vector.broadcast %cst_11 : f32 to vector<1x8x1xf32>
      %c0_12 = arith.constant 0 : index
      %c0_13 = arith.constant 0 : index
      %c0_14 = arith.constant 0 : index
      %14 = vector.load %arg5[%c0_12, %c0_13, %c0_14] : memref<1x8x1xf32, #tpu.memory_space<vmem>>, vector<1x8x1xf32>
      tpu.vector_store %arg5[%c0_12, %c0_13, %c0_14], %13 {strides = array<i32>} : memref<1x8x1xf32, #tpu.memory_space<vmem>>, vector<1x8x1xf32>,
    } else {
    }
    %c0 = arith.constant 0 : index
    %c0_1 = arith.constant 0 : index
    %c0_2 = arith.constant 0 : index
    %3 = vector.load %arg2[%c0, %c0_1, %c0_2] : memref<1x8x128xf32, #tpu.memory_space<vmem>>, vector<1x8x128xf32>
    %c0_3 = arith.constant 0 : index
    %c0_4 = arith.constant 0 : index
    %c0_5 = arith.constant 0 : index
    %4 = vector.load %arg5[%c0_3, %c0_4, %c0_5] : memref<1x8x1xf32, #tpu.memory_space<vmem>>, vector<1x8x1xf32>
    %5 = arith.mulf %3, %3 : vector<1x8x128xf32>
    %cst = arith.constant dense<0.000000e+00> : vector<1x8xf32>
    %6 = vector.multi_reduction <add>, %5, %cst [2] : vector<1x8x128xf32> to vector<1x8xf32>
    %7 = vector.shape_cast %6 : vector<1x8xf32> to vector<1x8x1xf32>
    %8 = arith.addf %4, %7 : vector<1x8x1xf32>
    %c0_6 = arith.constant 0 : index
    %c0_7 = arith.constant 0 : index
    %c0_8 = arith.constant 0 : index
    %9 = vector.load %arg5[%c0_6, %c0_7, %c0_8] : memref<1x8x1xf32, #tpu.memory_space<vmem>>, vector<1x8x1xf32>
    tpu.vector_store %arg5[%c0_6, %c0_7, %c0_8], %8 {strides = array<i32>} : memref<1x8x1xf32, #tpu.memory_space<vmem>>, vector<1x8x1xf32>,
    %c0_i32_9 = arith.constant 0 : i32
    %10 = arith.cmpi eq, %arg1, %c0_i32_9 : i32
    %11 = arith.extui %10 : i1 to i32
    %c0_i32_10 = arith.constant 0 : i32
    %12 = arith.cmpi ne, %11, %c0_i32_10 : i32
    scf.if %12 {
      %c0_11 = arith.constant 0 : index
      %c0_12 = arith.constant 0 : index
      %c0_13 = arith.constant 0 : index
      %13 = vector.load %arg5[%c0_11, %c0_12, %c0_13] : memref<1x8x1xf32, #tpu.memory_space<vmem>>, vector<1x8x1xf32>
      %14 = math.sqrt %13 : vector<1x8x1xf32>
      %cst_14 = arith.constant dense<0.000000e+00> : vector<1x1xf32>
      %15 = vector.multi_reduction <add>, %14, %cst_14 [1] : vector<1x8x1xf32> to vector<1x1xf32>
      %16 = vector.shape_cast %15 : vector<1x1xf32> to vector<1x1x1xf32>
      %cst_15 = arith.constant 2.500000e-01 : f32
      %17 = vector.broadcast %cst_15 : f32 to vector<1x1x1xf32>
      %18 = arith.mulf %16, %17 : vector<1x1x1xf32>
      %cst_16 = arith.constant 9.99999997E-7 : f32
      %19 = vector.broadcast %cst_16 : f32 to vector<1x1x1xf32>
      %20 = arith.addf %18, %19 : vector<1x1x1xf32>
      %21 = tpu.reciprocal %20 {approx = true} : vector<1x1x1xf32> -> vector<1x1x1xf32>
      %22 = vector.broadcast %21 : vector<1x1x1xf32> to vector<1x8x1xf32>
      %23 = arith.mulf %14, %22 : vector<1x8x1xf32>
      %c0_17 = arith.constant 0 : index
      %c0_18 = arith.constant 0 : index
      %c0_19 = arith.constant 0 : index
      %24 = vector.load %arg3[%c0_17, %c0_18, %c0_19] : memref<1x8x1xf32, #tpu.memory_space<vmem>>, vector<1x8x1xf32>
      %25 = arith.mulf %24, %23 : vector<1x8x1xf32>
      %cst_20 = arith.constant 1.000000e+00 : f32
      %26 = vector.broadcast %cst_20 : f32 to vector<1x8x1xf32>
      %27 = arith.addf %25, %26 : vector<1x8x1xf32>
      %c0_21 = arith.constant 0 : index
      %c0_22 = arith.constant 0 : index
      %c0_23 = arith.constant 0 : index
      %28 = vector.load %arg4[%c0_21, %c0_22, %c0_23] : memref<1x8x1xf32, #tpu.memory_space<vmem>>, vector<1x8x1xf32>
      tpu.vector_store %arg4[%c0_21, %c0_22, %c0_23], %27 {strides = array<i32>} : memref<1x8x1xf32, #tpu.memory_space<vmem>>, vector<1x8x1xf32>,
    } else {
    }
    return
  }
  func.func @transform_0(%arg0: i32, %arg1: i32) -> (i32, i32, i32) {
    %c0_i32 = arith.constant 0 : i32
    %c0_i32_0 = arith.constant 0 : i32
    return %arg0, %c0_i32, %arg1 : i32, i32, i32
  }
  func.func @transform_1(%arg0: i32, %arg1: i32) -> (i32, i32, i32) {
    %c0_i32 = arith.constant 0 : i32
    %c0_i32_0 = arith.constant 0 : i32
    %c0_i32_1 = arith.constant 0 : i32
    %c0_i32_2 = arith.constant 0 : i32
    return %c0_i32, %c0_i32_0, %c0_i32_1 : i32, i32, i32
  }
  func.func @transform_2(%arg0: i32, %arg1: i32) -> (i32, i32, i32) {
    %c0_i32 = arith.constant 0 : i32
    %c0_i32_0 = arith.constant 0 : i32
    %c0_i32_1 = arith.constant 0 : i32
    return %arg0, %c0_i32, %c0_i32_0 : i32, i32, i32
  }
}

</mosaic_0001>

<bundles_post_ra>
// kernel: tpu_custom_call.1
= control target key start
LH: loop header
LB: loop body
LE: loop exit
PB: predicated region body
PF: predicated region fallthrough
CT: control target
= control target key end

     0   :  { %7 = vsyncpa [#allocation4], 0  ;;  %s590_s0 = inlined_call_operand.hbm [shape: f32[2,8,128], index: 0, kind: input, shape index: {}]   ;;  %s591_s1 = inlined_call_operand.vmem [shape: f32[1,8,1], index: 1, kind: input, shape index: {}]   ;;  %s592_s2 = inlined_call_operand.vmem [shape: f32[2,8,1], index: 2, kind: output, shape index: {}]  }
   0x1   :  { %9 = vsyncpa [#allocation4 + $0x1], 0  ;;  %s458_s9 = smov 0   ;;  %s460_s10 = smov 0  }
   0x2   :  { %s462_s11 = smov 0   ;;  %s464_s12 = smov 0  }
   0x3   :  { %s466_s13 = smov 0   ;;  %s468_s14 = smov 0  }
   0x4 LB: > { %s288_s15 = sadd.s32 4294967295, %s439_s14   ;;  %s27_s16 = sadd.s32 1, %s435_s13  ;;  %s439_s14 = sphi %s468_s14, %s15_s14   ;;  %s435_s13 = sphi %s466_s13, %s602_s13   ;;  %s431_s12 = sphi %s464_s12, %s601_s12   ;;  %s427_s11 = sphi %s462_s11, %s600_s11   ;;  %s423_s10 = sphi %s460_s10, %s599_s10   ;;  %s419_s9 = sphi %s458_s9, %s598_s9  }
   0x5   : > { %p29_p0 = scmp.ge.s32.totalorder %s27_s16, 2  ;;  %s36_s17 = sadd.s32 1, %s427_s11 }
   0x6   : > { %p43_p1 = scmp.ne.s32.totalorder %s427_s11, %s423_s10  ;;  %p44_p2 = scmp.eq.s32.totalorder %s439_s14, 0 }
   0x7   : > { %s604_s16 = smov (%p29_p0, %s27_s16), 0  ;;  %p49_p4 = scmp.ne.s32.totalorder %s423_s10, %s419_s9 }
   0x8   : > { %p494_p3 = por %p44_p2, %p43_p1  ;;  %s31_s19 = ssub.s32 %s435_s13, %s604_s16 }
   0x9   : > { %p50_p5 = scmp.eq.s32.totalorder %s288_s15, 0  ;;  %p34_p6 = scmp.eq.s32.totalorder %s31_s19, 0 }
   0xa   : > { %p305_p8 = scmp.lt.s32.totalorder %s439_s14, 2  ;;  %s123_s22 = sand.u32 1, %s427_s11  }
   0xb   : > { %p501_p7 = por %p50_p5, %p49_p4  ;;  %s293_s23 = sshll.u32 %s435_s13, 7 }
   0xc   : > { %s507_s21 = scalar_select %p34_p6, %s427_s11, %s36_s17  }
   0xd   : > { %s292_s24 = sshll.u32 %s123_s22, 3  ;;  %s514_s27 = scalar_lea.hbm %s590_s0, %s293_s23 }
   0xe   : > { %s127_s28 = scalar_lea.vmem [#allocation3], %s292_s24  ;;  %p518_p9 = pnand %p305_p8, %p494_p3 }
   0xf   : > { %s135_s29 = sshll.u32 %s127_s28, 4  ;;  %s124_s3 = scalar_lea.sflag [#allocation4], %s123_s22  ;;  %s522_s29 = int_to_ptr.vmem [resolvable:$true] %s135_s29 }
  0x10   : > { %s359_s4 = scalar_lea.hbm %s514_s27, 128  ;;  %p361_p13 = pneg %p518_p9 }
  0x11   : > { %p360_p12 = scmp.ne.s32.totalorder %s514_s27, %s359_s4  ;;  %s364_s7 = scalar_lea.hbm %s590_s0, 256 }
  0x12   : > { %p365_p2 = scmp.lt.u32.totalorder %s514_s27, %s590_s0  ;;  %p366_p3 = scmp.lt.u32.totalorder %s364_s7, %s359_s4 }
  0x13   : > { %p362_p0 = pnand %p361_p13, %p360_p12  ;;  %p368_p5 = scmp.lt.u32.totalorder %s359_s4, %s514_s27 }
  0x14   : > { %p367_p4 = por %p366_p3, %p365_p2 }
  0x15   : > { %p363_p1 = pneg %p362_p0 }
  0x16   : > { %p369_p6 = por %p368_p5, %p367_p4 }
  0x18   : > { %p370_p8 = pnand %p369_p6, %p363_p1 }
  0x1a   : > { %373 = shalt.err (!%p370_p8)
}
  0x1b   : > { %s374_s15 = scalar_lea.vmem %s522_s29, 128  ;;  %s441_s17 = smov [#allocation3]  }
  0x1c   : > { %p375_p12 = scmp.ne.s32.totalorder %s522_s29, %s374_s15  ;;  %s379_s18 = sshll.u32 %s441_s17, 4  ;;  %s380_s18 = int_to_ptr.vmem [resolvable:$false] %s379_s18 }
  0x1d   : > { %s381_s19 = scalar_lea.vmem %s380_s18, 256  ;;  %p382_p11 = scmp.lt.s32.totalorder %s522_s29, %s380_s18 }
  0x1e   : > { %p377_p0 = pnand %p375_p12, %p361_p13  ;;  %p383_p2 = scmp.lt.s32.totalorder %s381_s19, %s374_s15 }
  0x20   : > { %p378_p10 = pneg %p377_p0  ;;  %p384_p3 = por %p383_p2, %p382_p11 }
  0x22   : > { %p385_p4 = pnand %p384_p3, %p378_p10 }
  0x24   : > { %388 = shalt.err (!%p385_p4)
}
  0x25   : > { %304 = dma.hbm_to_vmem [thread:$0]  (!%p518_p9), %s514_s27, 128, %s522_s29, %s124_s3  }
  0x26   : > { %p596_p1 = scmp.lt.s32.totalorder %s439_s14, 3  ;;  %p597_p5 = scmp.ge.s32.totalorder %s439_s14, 1 }
  0x28   : > { %p141_p13 = pnand %p597_p5, %p596_p1 }
  0x29   : > { %s146_s22 = sand.u32 (!%p141_p13), 1, %s423_s10  }
  0x2a   : > { %144 = sbr.rel (%p141_p13) target bundleno = 255 (0xff), region = 28  ;;  %s295_s23 = sshll.u32 (!%p141_p13), %s146_s22, 3 }
  0x2b   : > { %s147_s24 = scalar_lea.sflag (!%p141_p13), [#allocation4], %s146_s22  ;;  %s150_s25 = scalar_lea.vmem (!%p141_p13), [#allocation3], %s295_s23 }
  0x31   : > { %414 = dma.done.wait (%p501_p7), %s147_s24, 128  }
  0x32   : > { %416 = vsyncadd (%p501_p7), %s147_s24, 4294967168  ;;  %vm178_vm0 = vcmask 7168   ;;  %v442_v0 = vmov 0.0   ;;  %v180_v1 = vld [vmem:[%s150_s25] sm:$0xff]  ;;  %p170_p7 = scmp.lt.s32.totalorder %s431_s12, 1  ;;  %v210_v22 = vld [vmem:[%s591_s1] sm:$0xff] }
  0x33   : > { %179 = vst.msk [vmem:[#allocation2] sm:$0xff] %vm178_vm0, %v442_v0  ;;  %v182_v2 = vmul.f32 %v180_v1, %v180_v1 }
  0x34   : > { %s606_s12 = smov (!%p170_p7, %s431_s12), 1 }
  0x35   : > { %183 = vadd.xlane.f32.xlu0 %v182_v2  ;;  %s296_s27 = sshll.u32 %s606_s12, 3 }
  0x36   : > { %s173_s30 = scalar_lea.vmem %s592_s2, %s296_s27 }
  0x3a   : > { %v181_v3 = vld [vmem:[#allocation2] sm:$0xff] }
  0xc2   : > { %v184_v4 = vpop.xlane.xlu0 %183 }
  0xc3   : > { %v185_v5 = vadd.f32 %v184_v4, %v181_v3 }
  0xc5   : > { %187 = vst.msk [vmem:[#allocation2] sm:$0xff] %vm178_vm0, %v185_v5 }
  0xcc   : > { %v191_v6 = vld [vmem:[#allocation2] sm:$0xff] }
  0xcd   : > { %355 = vrsqrt.f32 %v191_v6  ;;  %vm194_vm1 = vcmp.eq.f32.partialorder %v191_v6, inf  ;;  %v197_v9 = vand.u32 2147483648, %v191_v6  ;;  %vm196_vm2 = vcmp.eq.f32.partialorder %v191_v6, 0.0 }
  0xd7   : > { %v356_v7 = vpop.eup %355 }
  0xd8   : > { %v193_v8 = vmul.f32 %v356_v7, %v191_v6 }
  0xda   : > { %v195_v10 = vsel %vm194_vm1, %v191_v6, %v193_v8 }
  0xdb   : > { %v198_v11 = vsel %vm196_vm2, %v197_v9, %v195_v10 }
  0xdc   : > { %v199_v12 = vsel %vm178_vm0, %v198_v11, 0.0 }
  0xdd   : > { %v200_v13 = vrot.slane %v199_v12, 4 }
  0xdf   : > { %v201_v14 = vadd.f32 %v200_v13, %v199_v12 }
  0xe1   : > { %v202_v15 = vrot.slane %v201_v14, 2 }
  0xe3   : > { %v203_v16 = vadd.f32 %v202_v15, %v201_v14 }
  0xe5   : > { %v204_v17 = vrot.slane %v203_v16, 1 }
  0xe7   : > { %v205_v18 = vadd.f32 %v204_v17, %v203_v16 }
  0xe9   : > { %v206_v19 = vmul.f32 0.25, %v205_v18 }
  0xeb   : > { %v207_v20 = vadd.f32 1e-06, %v206_v19 }
  0xed   : > { %357 = vrcp.f32 %v207_v20 }
  0xf7   : > { %v358_v21 = vpop.eup %357 }
  0xf8   : > { %v209_v23 = vmul.f32 %v358_v21, %v198_v11 }
  0xfa   : > { %v211_v24 = vmul.f32 %v210_v22, %v209_v23 }
  0xfc   : > { %v212_v25 = vadd.f32 1.0, %v211_v24 }
  0xfe   : > { %213 = vst.msk [vmem:[%s173_s30] sm:$0xff] %vm178_vm0, %v212_v25 }
  0xff PF: > { %s15_s14 = sadd.s32 1, %s439_s14   ;;  %s598_s9 = smov %s423_s10 }
 0x100   : > { %p12_p9 = scmp.ge.s32.totalorder %s15_s14, 4   ;;  %s599_s10 = smov %s427_s11 }
 0x101   : > { %s600_s11 = smov %s507_s21  ;;  %s601_s12 = smov %s435_s13 }
 0x102   : > { %s602_s13 = smov %s604_s16  ;;  %14 = sbr.rel (!%p12_p9) target bundleno = 4 (0x4), region = 76 }
 0x109   :  { %233 = vsyncpa [#allocation4], 1 }
 0x10a   :  { %235 = vsyncpa [#allocation4 + $0x1], 1 }

</bundles_post_ra>
